<compile_context>
chip_gen: v7x
topology: tpu7x:2x2x1
jax: 0.10.0
libtpu: 0.0.40
codegen_flags: <defaults>
</compile_context>

<pallas_src>
import jax
import jax.numpy as jnp
from jax.experimental import pallas as pl
from jax.experimental.pallas import tpu as pltpu

BN_EPS = 1e-5


def _round_up(x, m):
    return ((x + m - 1) // m) * m


def _cdiv(a, b):
    return -(-a // b)


def spectra_kernel(x_ref, w1_ref, b1_ref, w2_ref, b2_ref, o_ref):
    """Fused forward for one batch tile.

    x_ref:  (TB, n_dim)   caller dtype (f32 or bf16), VMEM, batch-tiled stream
    w1_ref: (n_dim, H_p)  compute dtype (bf16/f32), VMEM-resident
    b1_ref: (1, H_p)      f32, VMEM-resident
    w2_ref: (1, H_p)      f32, VMEM-resident (eval-BatchNorm already folded in)
    b2_ref: (1, 1)        f32, SMEM           (eval-BatchNorm already folded in)
    o_ref:  (1, 1, TB)    f32, VMEM, lane-dense probabilities
    """
    # Cast x to the matmul operand dtype in VMEM (no-op if caller supplies bf16).
    x = x_ref[...].astype(w1_ref.dtype)

    # Linear(n_dim -> hidden) on the MXU, f32 accumulation; bias + ReLU in f32
    # (f32 epilogue keeps this v5e-safe: no bf16 VPU/EUP there).
    h = jnp.dot(x, w1_ref[...], preferred_element_type=jnp.float32)   # (TB, H_p)
    h = jnp.maximum(h + b1_ref[...], 0.0)

    # Dropout = identity (eval).  BatchNorm folded into w2'/b2' by the wrapper.

    # Linear(hidden -> 1) as an "NT" matmul: (1,H_p) contracted with (TB,H_p)
    # over H -> (1, TB).  Result is lane-dense (batch along lanes) so the store
    # path is unmasked vst; the MXU has plenty of slack (kernel is HBM-bound).
    logits = jax.lax.dot_general(
        w2_ref[...], h, (((1,), (1,)), ((), ())),
        preferred_element_type=jnp.float32)                           # (1, TB)
    probs = jax.nn.sigmoid(logits + b2_ref[0, 0])
    o_ref[...] = probs.reshape(o_ref.shape)


def prepare_params(params, compute_dtype=jnp.bfloat16):
    """One-time parameter prep (hoisted out of the per-call hot path).

    Folds eval-mode BatchNorm into the second linear:
        s   = gamma / sqrt(var + eps)
        w2' = s * w2
        b2' = b2 + (beta - mean * s) @ w2
    and pads the hidden dim to the 128-lane width (zero pads -> exact math).
    """
    w1, b1 = params["w1"], params["b1"]
    n_dim, H = w1.shape
    H_p = _round_up(H, 128)

    s = params["gamma"] * jax.lax.rsqrt(params["running_var"] + BN_EPS)      # (1, H)
    w2_row = (params["w2"].reshape(1, H) * s).astype(jnp.float32)            # (1, H)
    b2_fold = (params["b2"]
               + (params["beta"] - params["running_mean"] * s) @ params["w2"])  # (1, 1)

    return dict(
        w1=jnp.pad(w1, ((0, 0), (0, H_p - H))).astype(compute_dtype),        # (n_dim, H_p)
        b1=jnp.pad(b1.reshape(1, H), ((0, 0), (0, H_p - H))).astype(jnp.float32),
        w2=jnp.pad(w2_row, ((0, 0), (0, H_p - H))),                          # (1, H_p)
        b2=b2_fold.reshape(1, 1).astype(jnp.float32),
    )


def spectra_forward(x, prep, expand_dim=True, max_block_rows=4096,
                    x_tile_budget_bytes=16 << 20):
    """Eval-mode forward.  Returns (B, 1) f32 probabilities.

    `prep` comes from prepare_params() (computed once, reused every call).
    x may be f32 or bf16; it is streamed as-is (no extra HBM pass).
    """
    x2d = x.reshape(x.shape[0], -1) if expand_dim else x     # metadata-only reshape
    B, n_dim = x2d.shape
    w1_p, b1_p, w2_p, b2_p = prep["w1"], prep["b1"], prep["w2"], prep["b2"]
    assert w1_p.shape[0] == n_dim, "prepared params do not match input feature dim"
    H_p = w1_p.shape[1]

    x_item = jnp.dtype(x2d.dtype).itemsize
    w_item = jnp.dtype(w1_p.dtype).itemsize
    n_dim_lane = _round_up(n_dim, 128)          # lane-padded VMEM footprint of x rows

    # ---- Batch-tile selection (x is the only streamed operand). ----
    row_align = 128 if B >= 128 else 8          # 128 -> unmasked lane-dense output stores
    tb = x_tile_budget_bytes // max(2 * n_dim_lane * x_item, 1)   # double-buffered x tile
    tb = max(row_align, min(max_block_rows, tb))
    tb = (tb // row_align) * row_align
    tb = min(tb, _round_up(B, row_align))       # don't tile past the batch
    if B >= 2 * row_align:                      # >=2 grid steps so v7x's 2 TCs both work
        tb = min(tb, _round_up(_cdiv(B, 2), row_align))
    TB = max(tb, row_align)
    num_tiles = _cdiv(B, TB)

    # ---- VMEM capacity-aware limit. ----
    try:
        vmem_cap = int(pltpu.get_tpu_info().vmem_capacity_bytes)
    except Exception:
        vmem_cap = 64 << 20                     # assume the smallest (v7x per-core)
    vmem_cap = (vmem_cap * 3) // 4

    def run(single_buffer_weights):
        resident = ({"pipeline_mode": pl.Buffered(1)}
                    if single_buffer_weights else {})
        w_bufs = 1 if single_buffer_weights else 2
        vmem_bytes = (
            2 * TB * n_dim_lane * x_item        # x tile (double-buffered)
            + TB * n_dim_lane * w_item          # in-kernel cast copy of x
            + w_bufs * n_dim_lane * H_p * w_item  # w1 (resident)
            + w_bufs * 2 * 8 * H_p * 4          # b1, w2' (sublane-padded)
            + 2 * TB * H_p * 4                  # f32 h + epilogue slack
            + 2 * 8 * TB * 4                    # (1, TB) out, sublane-padded, 2 buffers
        )
        vmem_limit = int(min(max(2 * vmem_bytes, 4 << 20), vmem_cap))

        out = pl.pallas_call(
            spectra_kernel,
            out_shape=jax.ShapeDtypeStruct((num_tiles, 1, TB), jnp.float32),
            grid=(num_tiles,),
            in_specs=[
                pl.BlockSpec((TB, n_dim), lambda i: (i, 0)),            # x: batch-tiled
                pl.BlockSpec((n_dim, H_p), lambda i: (0, 0), **resident),  # w1 resident
                pl.BlockSpec((1, H_p), lambda i: (0, 0), **resident),      # b1 resident
                pl.BlockSpec((1, H_p), lambda i: (0, 0), **resident),      # w2' resident
                pl.BlockSpec(memory_space=pltpu.MemorySpace.SMEM),         # b2' scalar
            ],
            out_specs=pl.BlockSpec((1, 1, TB), lambda i: (i, 0, 0)),        # lane-dense
            compiler_params=pltpu.CompilerParams(
                dimension_semantics=("parallel",),
                vmem_limit_bytes=vmem_limit,
            ),
        )(x2d, w1_p, b1_p, w2_p, b2_p)
        return out

    try:
        out = run(True)
    except Exception:
        # pipeline_mode / Buffered(1) not supported by this JAX build -> default buffering.
        out = run(False)

    # (num_tiles, 1, TB) -> flat batch order -> drop the partial-block tail.
    return out.reshape(num_tiles * TB)[:B].reshape(B, 1)


def init_params(key, n_dim, hidden_size):
    """Deterministic synthetic parameters (shapes from spectra_model.__init__)."""
    ks = jax.random.split(key, 6)
    w1 = jax.random.normal(ks[0], (n_dim, hidden_size), jnp.float32) * 0.05
    b1 = jax.random.normal(ks[1], (1, hidden_size), jnp.float32) * 0.05
    gamma = 1.0 + 0.1 * jax.random.normal(ks[2], (1, hidden_size), jnp.float32)
    beta = 0.1 * jax.random.normal(ks[3], (1, hidden_size), jnp.float32)
    running_mean = 0.1 * jax.random.normal(ks[4], (1, hidden_size), jnp.float32)
    running_var = 0.5 + jnp.abs(
        jax.random.normal(ks[5], (1, hidden_size), jnp.float32))
    w2 = jax.random.normal(jax.random.fold_in(key, 7),
                           (hidden_size, 1), jnp.float32) * 0.05
    b2 = jax.random.normal(jax.random.fold_in(key, 8), (1, 1), jnp.float32) * 0.05
    return dict(w1=w1, b1=b1, gamma=gamma, beta=beta,
                running_mean=running_mean, running_var=running_var,
                w2=w2, b2=b2)


def reference_forward(x, params, expand_dim=True):
    """Pure-JAX f32 reference (matches eval-mode PyTorch forward)."""
    x2d = x.reshape(x.shape[0], -1) if expand_dim else x
    h = jnp.maximum(x2d @ params["w1"] + params["b1"], 0.0)
    h = (h - params["running_mean"]) * jax.lax.rsqrt(
        params["running_var"] + BN_EPS) * params["gamma"] + params["beta"]
    return jax.nn.sigmoid(h @ params["w2"] + params["b2"])


if __name__ == "__main__":
    key = jax.random.PRNGKey(0)

    # Shapes implied by the forward with expandDim=True:
    # x: (batch=8, C=4, H=8, W=8) -> Flatten -> n_dim = 4*8*8 = 256, hidden = 32.
    B, C, H, W = 8, 4, 8, 8
    n_dim = C * H * W
    hidden_size = 32

    kx, kp = jax.random.split(key)
    x = jax.random.normal(kx, (B, C, H, W), jnp.float32)
    params = init_params(kp, n_dim, hidden_size)

    ref = reference_forward(x, params, expand_dim=True)

    # f32 operand path (validation of the BN fold / kernel math).  Tolerance
    # leaves room for Mosaic's default f32 matmul precision.
    prep_f32 = prepare_params(params, compute_dtype=jnp.float32)
    out_f32 = jax.block_until_ready(spectra_forward(x, prep_f32, expand_dim=True))
    assert out_f32.shape == (B, 1)
    assert jnp.allclose(out_f32, ref, atol=1e-3, rtol=1e-3), "f32 mismatch vs ref"

    # bf16 matmul-operand path (default / fast): parameters prepared once and
    # reused across calls; x streamed in native f32 and cast in-kernel.
    prep_bf16 = prepare_params(params)
    out_bf16 = jax.block_until_ready(spectra_forward(x, prep_bf16, expand_dim=True))
    assert out_bf16.shape == (B, 1)
    assert jnp.allclose(out_bf16, ref, atol=2e-2, rtol=2e-2), "bf16 mismatch vs ref"

    print("KERNEL_OK")
</pallas_src>

<mosaic_0001>
module attributes {stable_mosaic.version = 11 : i64} {
  func.func @spectra_kernel(%arg0: i32, %arg1: memref<8x256xf32, #tpu.memory_space<vmem>>, %arg2: memref<256x128xf32, #tpu.memory_space<vmem>>, %arg3: memref<1x128xf32, #tpu.memory_space<vmem>>, %arg4: memref<1x128xf32, #tpu.memory_space<vmem>>, %arg5: memref<1x1xf32, #tpu.memory_space<smem>>, %arg6: memref<1x1x8xf32, #tpu.memory_space<vmem>>) attributes {dimension_semantics = [#tpu.dimension_semantics<parallel>], iteration_bounds = array<i64: 1>, scalar_prefetch = 0 : i64, scratch_operands = 0 : i64, tpu.core_type = #tpu.core_type<tc>, window_params = [{transform_indices = @transform_0, window_bounds = array<i64: 8, 256>}, {pipeline_mode = #tpu.pipeline_mode<synchronous>, transform_indices = @transform_1, window_bounds = array<i64: 256, 128>}, {pipeline_mode = #tpu.pipeline_mode<synchronous>, transform_indices = @transform_2, window_bounds = array<i64: 1, 128>}, {pipeline_mode = #tpu.pipeline_mode<synchronous>, transform_indices = @transform_3, window_bounds = array<i64: 1, 128>}, {transform_indices = @transform_4, window_bounds = array<i64: 1, 1>}, {transform_indices = @transform_5, window_bounds = array<i64: 1, 1, 8>}]} {
    %c0 = arith.constant 0 : index
    %c0_0 = arith.constant 0 : index
    %0 = vector.load %arg1[%c0, %c0_0] : memref<8x256xf32, #tpu.memory_space<vmem>>, vector<8x256xf32>
    %c0_1 = arith.constant 0 : index
    %c0_2 = arith.constant 0 : index
    %1 = vector.load %arg2[%c0_1, %c0_2] : memref<256x128xf32, #tpu.memory_space<vmem>>, vector<256x128xf32>
    %cst = arith.constant dense<0.000000e+00> : vector<8x128xf32>
    %2 = tpu.matmul %0, %1, %cst {dimension_numbers = #tpu.dot_dimension_numbers<[1], [0], [0], [1], [0, 0, 1, 1], [], []>} : vector<8x256xf32>, vector<256x128xf32>, vector<8x128xf32> -> vector<8x128xf32>
    %c0_3 = arith.constant 0 : index
    %c0_4 = arith.constant 0 : index
    %3 = vector.load %arg3[%c0_3, %c0_4] : memref<1x128xf32, #tpu.memory_space<vmem>>, vector<1x128xf32>
    %4 = vector.broadcast %3 : vector<1x128xf32> to vector<8x128xf32>
    %5 = arith.addf %2, %4 : vector<8x128xf32>
    %cst_5 = arith.constant 0.000000e+00 : f32
    %6 = vector.broadcast %cst_5 : f32 to vector<8x128xf32>
    %7 = arith.maximumf %5, %6 : vector<8x128xf32>
    %c0_6 = arith.constant 0 : index
    %c0_7 = arith.constant 0 : index
    %8 = vector.load %arg4[%c0_6, %c0_7] : memref<1x128xf32, #tpu.memory_space<vmem>>, vector<1x128xf32>
    %cst_8 = arith.constant dense<0.000000e+00> : vector<1x8xf32>
    %9 = tpu.matmul %8, %7, %cst_8 {dimension_numbers = #tpu.dot_dimension_numbers<[1], [1], [0], [0], [0, 0, 1, 0], [], []>} : vector<1x128xf32>, vector<8x128xf32>, vector<1x8xf32> -> vector<1x8xf32>
    %c0_9 = arith.constant 0 : index
    %c0_10 = arith.constant 0 : index
    %10 = memref.load %arg5[%c0_9, %c0_10] : memref<1x1xf32, #tpu.memory_space<smem>>
    %11 = vector.broadcast %10 : f32 to vector<1x8xf32>
    %12 = arith.addf %9, %11 : vector<1x8xf32>
    %13 = arith.negf %12 : vector<1x8xf32>
    %14 = math.exp %13 : vector<1x8xf32>
    %cst_11 = arith.constant 1.000000e+00 : f32
    %15 = vector.broadcast %cst_11 : f32 to vector<1x8xf32>
    %16 = arith.addf %15, %14 : vector<1x8xf32>
    %17 = arith.divf %15, %16 : vector<1x8xf32>
    %18 = vector.shape_cast %17 : vector<1x8xf32> to vector<1x1x8xf32>
    %c0_12 = arith.constant 0 : index
    %c0_13 = arith.constant 0 : index
    %c0_14 = arith.constant 0 : index
    %19 = vector.load %arg6[%c0_12, %c0_13, %c0_14] : memref<1x1x8xf32, #tpu.memory_space<vmem>>, vector<1x1x8xf32>
    tpu.vector_store %arg6[%c0_12, %c0_13, %c0_14], %18 {strides = array<i32>} : memref<1x1x8xf32, #tpu.memory_space<vmem>>, vector<1x1x8xf32>,
    return
  }
  func.func @transform_0(%arg0: i32) -> (i32, i32) {
    %c0_i32 = arith.constant 0 : i32
    %c0_i32_0 = arith.constant 0 : i32
    return %arg0, %c0_i32 : i32, i32
  }
  func.func @transform_1(%arg0: i32) -> (i32, i32) {
    %c0_i32 = arith.constant 0 : i32
    %c0_i32_0 = arith.constant 0 : i32
    %c0_i32_1 = arith.constant 0 : i32
    return %c0_i32, %c0_i32_0 : i32, i32
  }
  func.func @transform_2(%arg0: i32) -> (i32, i32) {
    %c0_i32 = arith.constant 0 : i32
    %c0_i32_0 = arith.constant 0 : i32
    %c0_i32_1 = arith.constant 0 : i32
    return %c0_i32, %c0_i32_0 : i32, i32
  }
  func.func @transform_3(%arg0: i32) -> (i32, i32) {
    %c0_i32 = arith.constant 0 : i32
    %c0_i32_0 = arith.constant 0 : i32
    %c0_i32_1 = arith.constant 0 : i32
    return %c0_i32, %c0_i32_0 : i32, i32
  }
  func.func @transform_4(%arg0: i32) -> (i32, i32) {
    %c0_i32 = arith.constant 0 : i32
    %c0_i32_0 = arith.constant 0 : i32
    %c0_i32_1 = arith.constant 0 : i32
    return %c0_i32, %c0_i32_0 : i32, i32
  }
  func.func @transform_5(%arg0: i32) -> (i32, i32, i32) {
    %c0_i32 = arith.constant 0 : i32
    %c0_i32_0 = arith.constant 0 : i32
    %c0_i32_1 = arith.constant 0 : i32
    return %arg0, %c0_i32, %c0_i32_0 : i32, i32, i32
  }
}

module attributes {stable_mosaic.version = 11 : i64} {
  func.func @spectra_kernel(%arg0: i32, %arg1: memref<8x256xf32, #tpu.memory_space<vmem>>, %arg2: memref<256x128xf32, #tpu.memory_space<vmem>>, %arg3: memref<1x128xf32, #tpu.memory_space<vmem>>, %arg4: memref<1x128xf32, #tpu.memory_space<vmem>>, %arg5: memref<1x1xf32, #tpu.memory_space<smem>>, %arg6: memref<1x1x8xf32, #tpu.memory_space<vmem>>) attributes {dimension_semantics = [#tpu.dimension_semantics<parallel>], iteration_bounds = array<i64: 1>, scalar_prefetch = 0 : i64, scratch_operands = 0 : i64, tpu.core_type = #tpu.core_type<tc>, window_params = [{transform_indices = @transform_0, window_bounds = array<i64: 8, 256>}, {pipeline_mode = #tpu.pipeline_mode<synchronous>, transform_indices = @transform_1, window_bounds = array<i64: 256, 128>}, {pipeline_mode = #tpu.pipeline_mode<synchronous>, transform_indices = @transform_2, window_bounds = array<i64: 1, 128>}, {pipeline_mode = #tpu.pipeline_mode<synchronous>, transform_indices = @transform_3, window_bounds = array<i64: 1, 128>}, {transform_indices = @transform_4, window_bounds = array<i64: 1, 1>}, {transform_indices = @transform_5, window_bounds = array<i64: 1, 1, 8>}]} {
    %c0 = arith.constant 0 : index
    %c0_0 = arith.constant 0 : index
    %0 = vector.load %arg1[%c0, %c0_0] : memref<8x256xf32, #tpu.memory_space<vmem>>, vector<8x256xf32>
    %c0_1 = arith.constant 0 : index
    %c0_2 = arith.constant 0 : index
    %1 = vector.load %arg2[%c0_1, %c0_2] : memref<256x128xf32, #tpu.memory_space<vmem>>, vector<256x128xf32>
    %cst = arith.constant dense<0.000000e+00> : vector<8x128xf32>
    %2 = tpu.matmul %0, %1, %cst {dimension_numbers = #tpu.dot_dimension_numbers<[1], [0], [0], [1], [0, 0, 1, 1], [], []>} : vector<8x256xf32>, vector<256x128xf32>, vector<8x128xf32> -> vector<8x128xf32>
    %c0_3 = arith.constant 0 : index
    %c0_4 = arith.constant 0 : index
    %3 = vector.load %arg3[%c0_3, %c0_4] : memref<1x128xf32, #tpu.memory_space<vmem>>, vector<1x128xf32>
    %4 = vector.broadcast %3 : vector<1x128xf32> to vector<8x128xf32>
    %5 = arith.addf %2, %4 : vector<8x128xf32>
    %cst_5 = arith.constant 0.000000e+00 : f32
    %6 = vector.broadcast %cst_5 : f32 to vector<8x128xf32>
    %7 = arith.maximumf %5, %6 : vector<8x128xf32>
    %c0_6 = arith.constant 0 : index
    %c0_7 = arith.constant 0 : index
    %8 = vector.load %arg4[%c0_6, %c0_7] : memref<1x128xf32, #tpu.memory_space<vmem>>, vector<1x128xf32>
    %cst_8 = arith.constant dense<0.000000e+00> : vector<1x8xf32>
    %9 = tpu.matmul %8, %7, %cst_8 {dimension_numbers = #tpu.dot_dimension_numbers<[1], [1], [0], [0], [0, 0, 1, 0], [], []>} : vector<1x128xf32>, vector<8x128xf32>, vector<1x8xf32> -> vector<1x8xf32>
    %c0_9 = arith.constant 0 : index
    %c0_10 = arith.constant 0 : index
    %10 = memref.load %arg5[%c0_9, %c0_10] : memref<1x1xf32, #tpu.memory_space<smem>>
    %11 = vector.broadcast %10 : f32 to vector<1x8xf32>
    %12 = arith.addf %9, %11 : vector<1x8xf32>
    %13 = arith.negf %12 : vector<1x8xf32>
    %14 = math.exp %13 : vector<1x8xf32>
    %cst_11 = arith.constant 1.000000e+00 : f32
    %15 = vector.broadcast %cst_11 : f32 to vector<1x8xf32>
    %16 = arith.addf %15, %14 : vector<1x8xf32>
    %17 = arith.divf %15, %16 : vector<1x8xf32>
    %18 = vector.shape_cast %17 : vector<1x8xf32> to vector<1x1x8xf32>
    %c0_12 = arith.constant 0 : index
    %c0_13 = arith.constant 0 : index
    %c0_14 = arith.constant 0 : index
    %19 = vector.load %arg6[%c0_12, %c0_13, %c0_14] : memref<1x1x8xf32, #tpu.memory_space<vmem>>, vector<1x1x8xf32>
    tpu.vector_store %arg6[%c0_12, %c0_13, %c0_14], %18 {strides = array<i32>} : memref<1x1x8xf32, #tpu.memory_space<vmem>>, vector<1x1x8xf32>,
    return
  }
  func.func @transform_0(%arg0: i32) -> (i32, i32) {
    %c0_i32 = arith.constant 0 : i32
    %c0_i32_0 = arith.constant 0 : i32
    return %arg0, %c0_i32 : i32, i32
  }
  func.func @transform_1(%arg0: i32) -> (i32, i32) {
    %c0_i32 = arith.constant 0 : i32
    %c0_i32_0 = arith.constant 0 : i32
    %c0_i32_1 = arith.constant 0 : i32
    return %c0_i32, %c0_i32_0 : i32, i32
  }
  func.func @transform_2(%arg0: i32) -> (i32, i32) {
    %c0_i32 = arith.constant 0 : i32
    %c0_i32_0 = arith.constant 0 : i32
    %c0_i32_1 = arith.constant 0 : i32
    return %c0_i32, %c0_i32_0 : i32, i32
  }
  func.func @transform_3(%arg0: i32) -> (i32, i32) {
    %c0_i32 = arith.constant 0 : i32
    %c0_i32_0 = arith.constant 0 : i32
    %c0_i32_1 = arith.constant 0 : i32
    return %c0_i32, %c0_i32_0 : i32, i32
  }
  func.func @transform_4(%arg0: i32) -> (i32, i32) {
    %c0_i32 = arith.constant 0 : i32
    %c0_i32_0 = arith.constant 0 : i32
    %c0_i32_1 = arith.constant 0 : i32
    return %c0_i32, %c0_i32_0 : i32, i32
  }
  func.func @transform_5(%arg0: i32) -> (i32, i32, i32) {
    %c0_i32 = arith.constant 0 : i32
    %c0_i32_0 = arith.constant 0 : i32
    %c0_i32_1 = arith.constant 0 : i32
    return %arg0, %c0_i32, %c0_i32_0 : i32, i32, i32
  }
}

</mosaic_0001>

<bundles_post_ra>
// kernel: tpu_custom_call.1
= control target key start
LH: loop header
LB: loop body
LE: loop exit
PB: predicated region body
PF: predicated region fallthrough
CT: control target
= control target key end

     0   :  { %11 = vsyncpa [#allocation4], 0  ;;  %s505_s0 = inlined_call_operand.hbm [shape: f32[8,256], index: 0, kind: input, shape index: {}]   ;;  %s506_s1 = inlined_call_operand.hbm [shape: f32[256,128], index: 1, kind: input, shape index: {}]   ;;  %s507_s2 = inlined_call_operand.vmem [shape: f32[1,128], index: 2, kind: input, shape index: {}]   ;;  %s508_s3 = inlined_call_operand.vmem [shape: f32[1,128], index: 3, kind: input, shape index: {}]   ;;  %s509_s4 = inlined_call_operand.<no memory space> [shape: f32[1,1], index: 4, kind: input, shape index: {}]   ;;  %s510_s5 = inlined_call_operand.hbm [shape: f32[1,1,8], index: 5, kind: output, shape index: {}]  }
   0x1   :  { %12 = vsyncpa [#allocation7], 0 }
   0x2   :  { %13 = vsyncpa [#allocation5], 0  ;;  %s416_s18 = smov [#allocation3]   ;;  %s417_s20 = smov [#allocation6]  }
   0x3   :  { %s20_s19 = sshll.u32 %s416_s18, 4  ;;  %s29_s21 = sshll.u32 %s417_s20, 4  ;;  %s21_s19 = int_to_ptr.vmem [resolvable:$true] %s20_s19  ;;  %s453_s21 = int_to_ptr.vmem [resolvable:$true] %s29_s21 }
   0x4   :  { %s344_s24 = scalar_lea.hbm %s505_s0, 256 }
   0x5   :  { %p345_p0 = scmp.ne.s32.totalorder %s505_s0, %s344_s24  ;;  %p348_p1 = scmp.lt.u32.totalorder %s344_s24, %s505_s0 }
   0x7   :  { %p350_p2 = pnand %p348_p1, %p345_p0 }
   0x9   :  { %353 = shalt.err (!%p350_p2)
}
   0xa   :  { %s354_s29 = scalar_lea.vmem %s21_s19, 256  ;;  %p359_p4 = scmp.lt.s32.totalorder %s21_s19, %s21_s19 }
   0xb   :  { %p355_p3 = scmp.ne.s32.totalorder %s21_s19, %s354_s29  ;;  %p360_p5 = scmp.lt.s32.totalorder %s354_s29, %s354_s29 }
   0xd   :  { %p361_p6 = por %p360_p5, %p359_p4 }
   0xf   :  { %p362_p7 = pnand %p361_p6, %p355_p3 }
  0x11   :  { %365 = shalt.err (!%p362_p7)
}
  0x12   :  { %23 = dma.hbm_to_vmem [thread:$0]  %s505_s0, 256, %s21_s19, [#allocation4]  }
  0x13   :  { %s366_s9 = scalar_lea.hbm %s506_s1, 4096 }
  0x14   :  { %p367_p8 = scmp.ne.s32.totalorder %s506_s1, %s366_s9  ;;  %p370_p9 = scmp.lt.u32.totalorder %s366_s9, %s506_s1 }
  0x16   :  { %p372_p10 = pnand %p370_p9, %p367_p8 }
  0x18   :  { %375 = shalt.err (!%p372_p10)
}
  0x19   :  { %s376_s14 = scalar_lea.vmem %s453_s21, 4096  ;;  %p381_p12 = scmp.lt.s32.totalorder %s453_s21, %s453_s21 }
  0x1a   :  { %p377_p11 = scmp.ne.s32.totalorder %s453_s21, %s376_s14  ;;  %p382_p13 = scmp.lt.s32.totalorder %s376_s14, %s376_s14 }
  0x1c   :  { %p383_p0 = por %p382_p13, %p381_p12 }
  0x1e   :  { %p384_p1 = pnand %p383_p0, %p377_p11 }
  0x20   :  { %387 = shalt.err (!%p384_p1)
}
  0x21   :  { %s418_s0 = smov 128   ;;  %s419_s15 = smov 8  }
  0x22   :  { %35 = dma.hbm_to_vmem [thread:$0]  %s506_s1, 4096, %s453_s21, [#allocation7], %s418_s0, %s418_s0, %s419_s15  }
  0x23   :  { %410 = dma.done.wait [#allocation4], 256  }
  0x24   :  { %411 = vsyncadd [#allocation4], 4294967040 }
  0x25   :  { %412 = dma.done.wait [#allocation7], 4096  }
  0x26   :  { %413 = vsyncadd [#allocation7], 4294963200  ;;  %v66_v0 = vld [vmem:[#allocation6 + $0x80] sm:$0xff]  ;;  %v67_v1 = vld [vmem:[#allocation6 + $0x88] sm:$0xff]  ;;  %v420_v50 = vmov 0.0   ;;  %vm421_vm0 = vmmov 0   ;;  %v162_v58 = vstv %s509_s4 }
  0x27   :  { %v50_v2 = vld [vmem:[#allocation6] sm:$0xff]  ;;  %v301_v3 = vpack.c.bf16 %v67_v1, %v66_v0  ;;  %v51_v4 = vld [vmem:[#allocation6 + $0x8] sm:$0xff]  ;;  %v68_v5 = vld [vmem:[#allocation6 + $0x90] sm:$0xff]  ;;  %296 = vmatprep.subr.mxu1 %v420_v50  ;;  %298 = vmatprep.mubr.msk.f32.mxu1 %vm421_vm0, %v420_v50  ;;  %vm239_vm1 = vcmask 57344  }
  0x28   :  { %v69_v6 = vld [vmem:[#allocation6 + $0x98] sm:$0xff]  ;;  %v303_v7 = vpack.c.bf16 %v51_v4, %v50_v2  ;;  %v52_v9 = vld [vmem:[#allocation6 + $0x10] sm:$0xff]  ;;  %v70_v11 = vld [vmem:[#allocation6 + $0xa0] sm:$0xff] }
  0x29   :  { %v305_v8 = vpack.c.bf16 %v69_v6, %v68_v5  ;;  %v53_v10 = vld [vmem:[#allocation6 + $0x18] sm:$0xff]  ;;  %302 = vmatprep.subr.bf16.mxu0 %v301_v3  ;;  %v71_v12 = vld [vmem:[#allocation6 + $0xa8] sm:$0xff]  ;;  %v54_v15 = vld [vmem:[#allocation6 + $0x20] sm:$0xff] }
  0x2a   :  { %304 = vmatpush3.bf16.msra.mxu0 %v303_v7  ;;  %v307_v13 = vpack.c.bf16 %v53_v10, %v52_v9  ;;  %v309_v14 = vpack.c.bf16 %v71_v12, %v70_v11  ;;  %v55_v16 = vld [vmem:[#allocation6 + $0x28] sm:$0xff]  ;;  %v72_v17 = vld [vmem:[#allocation6 + $0xb0] sm:$0xff]  ;;  %v73_v18 = vld [vmem:[#allocation6 + $0xb8] sm:$0xff] }
  0x2b   :  { %306 = vmatprep.subr.bf16.mxu0 %v305_v8  ;;  %v311_v19 = vpack.c.bf16 %v55_v16, %v54_v15  ;;  %v313_v20 = vpack.c.bf16 %v73_v18, %v72_v17  ;;  %v56_v21 = vld [vmem:[#allocation6 + $0x30] sm:$0xff]  ;;  %v57_v22 = vld [vmem:[#allocation6 + $0x38] sm:$0xff]  ;;  %v74_v23 = vld [vmem:[#allocation6 + $0xc0] sm:$0xff] }
  0x2c   :  { %v75_v24 = vld [vmem:[#allocation6 + $0xc8] sm:$0xff]  ;;  %v49_v25 = vld [vmem:[#allocation3 + $0x8] sm:$0xff]  ;;  %v315_v26 = vpack.c.bf16 %v57_v22, %v56_v21  ;;  %v58_v28 = vld [vmem:[#allocation6 + $0x40] sm:$0xff] }
  0x2d   :  { %153 = vmatprep.mubr.f32.mxu0 %v49_v25  ;;  %v317_v27 = vpack.c.bf16 %v75_v24, %v74_v23  ;;  %v59_v29 = vld [vmem:[#allocation6 + $0x48] sm:$0xff]  ;;  %v76_v30 = vld [vmem:[#allocation6 + $0xd0] sm:$0xff]  ;;  %v77_v31 = vld [vmem:[#allocation6 + $0xd8] sm:$0xff] }
  0x2e   :  { %308 = vmatpush3.bf16.msra.mxu0 %v307_v13  ;;  %v319_v32 = vpack.c.bf16 %v59_v29, %v58_v28  ;;  %v321_v33 = vpack.c.bf16 %v77_v31, %v76_v30  ;;  %v60_v34 = vld [vmem:[#allocation6 + $0x50] sm:$0xff]  ;;  %v61_v35 = vld [vmem:[#allocation6 + $0x58] sm:$0xff]  ;;  %v78_v36 = vld [vmem:[#allocation6 + $0xe0] sm:$0xff] }
  0x2f   :  { %310 = vmatprep.subr.bf16.mxu0 %v309_v14  ;;  %v79_v37 = vld [vmem:[#allocation6 + $0xe8] sm:$0xff]  ;;  %v323_v38 = vpack.c.bf16 %v61_v35, %v60_v34  ;;  %v62_v40 = vld [vmem:[#allocation6 + $0x60] sm:$0xff]  ;;  %v80_v42 = vld [vmem:[#allocation6 + $0xf0] sm:$0xff] }
  0x30   :  { %v325_v39 = vpack.c.bf16 %v79_v37, %v78_v36  ;;  %v63_v41 = vld [vmem:[#allocation6 + $0x68] sm:$0xff]  ;;  %v81_v43 = vld [vmem:[#allocation6 + $0xf8] sm:$0xff]  ;;  %v64_v46 = vld [vmem:[#allocation6 + $0x70] sm:$0xff] }
  0x31   :  { %v327_v44 = vpack.c.bf16 %v63_v41, %v62_v40  ;;  %v329_v45 = vpack.c.bf16 %v81_v43, %v80_v42  ;;  %v65_v47 = vld [vmem:[#allocation6 + $0x78] sm:$0xff]  ;;  %v48_v49 = vld [vmem:[#allocation3] sm:$0xff] }
  0x32   :  { %312 = vmatpush3.bf16.msra.mxu0 %v311_v19  ;;  %v331_v48 = vpack.c.bf16 %v65_v47, %v64_v46  ;;  %v257_v53 = vld [vmem:[%s507_s2] ss:$0 sm:$0xff]  ;;  %s422_s2 = smov [#allocation8]  }
  0x33   :  { %314 = vmatprep.subr.bf16.mxu0 %v313_v20  ;;  %v160_v57 = vld [vmem:[%s508_s3] sm:$0x1]  ;;  %s247_s23 = sshll.u32 %s422_s2, 4  ;;  %s248_s23 = int_to_ptr.vmem [resolvable:$true] %s247_s23 }
  0x34   :  { %s388_s3 = scalar_lea.vmem %s248_s23, 16  ;;  %s392_s24 = scalar_lea.vmem %s248_s23, 32 }
  0x35   :  { %p389_p2 = scmp.ne.s32.totalorder %s248_s23, %s388_s3  ;;  %p393_p3 = scmp.lt.s32.totalorder %s248_s23, %s248_s23 }
  0x36   :  { %316 = vmatpush3.bf16.msra.mxu0 %v315_v26  ;;  %p394_p4 = scmp.lt.s32.totalorder %s392_s24, %s388_s3 }
  0x37   :  { %318 = vmatprep.subr.bf16.mxu0 %v317_v27 }
  0x38   :  { %p395_p5 = por %p394_p4, %p393_p3 }
  0x3a   :  { %320 = vmatpush3.bf16.msra.mxu0 %v319_v32  ;;  %p396_p6 = pnand %p395_p5, %p389_p2 }
  0x3b   :  { %322 = vmatprep.subr.bf16.mxu0 %v321_v33 }
  0x3e   :  { %324 = vmatpush3.bf16.msra.mxu0 %v323_v38 }
  0x3f   :  { %326 = vmatprep.subr.bf16.mxu0 %v325_v39 }
  0x42   :  { %328 = vmatpush3.bf16.msra.mxu0 %v327_v44 }
  0x43   :  { %330 = vmatprep.subr.bf16.mxu0 %v329_v45 }
  0x46   :  { %332 = vmatpush3.bf16.msra.mxu0 %v331_v48 }
  0x49   :  { %154 = vmatmul.mubr.f32.vlgmr.msra.gmra.mrb[0].mxu0 %v48_v49 }
 0x11c   :  { %v291_v51 = vpop.f32.mrb[0].mxu0 }
 0x11d   :  { %v292_v52 = vpop.f32.mrb[1].mxu0 }
 0x11e   :  { %v293_v54 = vadd.f32 %v292_v52, %v291_v51 }
 0x120   :  { %v156_v55 = vadd.f32 %v293_v54, %v257_v53 }
 0x122   :  { %v159_v56 = vmax.f32 %v156_v55, 0.0 }
 0x124   :  { %297 = vmatpush3.xpose.msra.mxu1 %v159_v56 }
 0x127   :  { %299 = vmatmul.mubr.f32.vlgmr.msra.gmra.mrb[0].mxu1 %v160_v57 }
 0x1fa   :  { %v229_v59 = vpop.f32.mrb[0].mxu1 }
 0x1fb   :  { %v230_v60 = vadd.f32 %v229_v59, %v162_v58  ;;  %v300_v61 = vpop.f32.mrb[1].mxu1 }
 0x1fd   :  { %v258_v62 = vmul.f32 -1.442695, %v230_v60 }
 0x1ff   :  { %340 = vpow2.f32 %v258_v62 }
 0x209   :  { %v341_v63 = vpop.eup %340 }
 0x20a   :  { %v236_v0 = vadd.f32 1.0, %v341_v63 }
 0x20c   :  { %342 = vrcp.f32 %v236_v0 }
 0x216   :  { %v343_v1 = vpop.eup %342 }
 0x217   :  { %240 = vst.msk [vmem:[#allocation8] sm:$0x1] %vm239_vm1, %v343_v1 }
 0x218   :  { %399 = shalt.err (!%p396_p6)
}
 0x219   :  { %s400_s26 = scalar_lea.hbm %s510_s5, 16 }
 0x21a   :  { %p401_p7 = scmp.ne.s32.totalorder %s510_s5, %s400_s26  ;;  %p404_p8 = scmp.lt.u32.totalorder %s400_s26, %s510_s5 }
 0x21c   :  { %p406_p9 = pnand %p404_p8, %p401_p7 }
 0x21e   :  { %409 = shalt.err (!%p406_p9)
}
 0x21f   :  { %250 = dma.vmem_to_hbm [thread:$0]  %s248_s23, 16, %s510_s5, [#allocation5]  }
 0x220   :  { %414 = dma.done.wait [#allocation5], 16  }
 0x221   :  { %415 = vsyncadd [#allocation5], 4294967280 }
 0x222   :  { %254 = vsyncpa [#allocation4], 1 }
 0x223   :  { %255 = vsyncpa [#allocation7], 1 }
 0x224   :  { %256 = vsyncpa [#allocation5], 1 }

// kernel: tpu_custom_call.1
= control target key start
LH: loop header
LB: loop body
LE: loop exit
PB: predicated region body
PF: predicated region fallthrough
CT: control target
= control target key end

     0   :  { %11 = vsyncpa [#allocation4], 0  ;;  %s505_s0 = inlined_call_operand.hbm [shape: f32[8,256], index: 0, kind: input, shape index: {}]   ;;  %s506_s1 = inlined_call_operand.hbm [shape: f32[256,128], index: 1, kind: input, shape index: {}]   ;;  %s507_s2 = inlined_call_operand.vmem [shape: f32[1,128], index: 2, kind: input, shape index: {}]   ;;  %s508_s3 = inlined_call_operand.vmem [shape: f32[1,128], index: 3, kind: input, shape index: {}]   ;;  %s509_s4 = inlined_call_operand.<no memory space> [shape: f32[1,1], index: 4, kind: input, shape index: {}]   ;;  %s510_s5 = inlined_call_operand.hbm [shape: f32[1,1,8], index: 5, kind: output, shape index: {}]  }
   0x1   :  { %12 = vsyncpa [#allocation7], 0 }
   0x2   :  { %13 = vsyncpa [#allocation5], 0  ;;  %s416_s18 = smov [#allocation3]   ;;  %s417_s20 = smov [#allocation6]  }
   0x3   :  { %s20_s19 = sshll.u32 %s416_s18, 4  ;;  %s29_s21 = sshll.u32 %s417_s20, 4  ;;  %s21_s19 = int_to_ptr.vmem [resolvable:$true] %s20_s19  ;;  %s453_s21 = int_to_ptr.vmem [resolvable:$true] %s29_s21 }
   0x4   :  { %s344_s24 = scalar_lea.hbm %s505_s0, 256 }
   0x5   :  { %p345_p0 = scmp.ne.s32.totalorder %s505_s0, %s344_s24  ;;  %p348_p1 = scmp.lt.u32.totalorder %s344_s24, %s505_s0 }
   0x7   :  { %p350_p2 = pnand %p348_p1, %p345_p0 }
   0x9   :  { %353 = shalt.err (!%p350_p2)
}
   0xa   :  { %s354_s29 = scalar_lea.vmem %s21_s19, 256  ;;  %p359_p4 = scmp.lt.s32.totalorder %s21_s19, %s21_s19 }
   0xb   :  { %p355_p3 = scmp.ne.s32.totalorder %s21_s19, %s354_s29  ;;  %p360_p5 = scmp.lt.s32.totalorder %s354_s29, %s354_s29 }
   0xd   :  { %p361_p6 = por %p360_p5, %p359_p4 }
   0xf   :  { %p362_p7 = pnand %p361_p6, %p355_p3 }
  0x11   :  { %365 = shalt.err (!%p362_p7)
}
  0x12   :  { %23 = dma.hbm_to_vmem [thread:$0]  %s505_s0, 256, %s21_s19, [#allocation4]  }
  0x13   :  { %s366_s9 = scalar_lea.hbm %s506_s1, 4096 }
  0x14   :  { %p367_p8 = scmp.ne.s32.totalorder %s506_s1, %s366_s9  ;;  %p370_p9 = scmp.lt.u32.totalorder %s366_s9, %s506_s1 }
  0x16   :  { %p372_p10 = pnand %p370_p9, %p367_p8 }
  0x18   :  { %375 = shalt.err (!%p372_p10)
}
  0x19   :  { %s376_s14 = scalar_lea.vmem %s453_s21, 4096  ;;  %p381_p12 = scmp.lt.s32.totalorder %s453_s21, %s453_s21 }
  0x1a   :  { %p377_p11 = scmp.ne.s32.totalorder %s453_s21, %s376_s14  ;;  %p382_p13 = scmp.lt.s32.totalorder %s376_s14, %s376_s14 }
  0x1c   :  { %p383_p0 = por %p382_p13, %p381_p12 }
  0x1e   :  { %p384_p1 = pnand %p383_p0, %p377_p11 }
  0x20   :  { %387 = shalt.err (!%p384_p1)
}
  0x21   :  { %s418_s0 = smov 128   ;;  %s419_s15 = smov 8  }
  0x22   :  { %35 = dma.hbm_to_vmem [thread:$0]  %s506_s1, 4096, %s453_s21, [#allocation7], %s418_s0, %s418_s0, %s419_s15  }
  0x23   :  { %410 = dma.done.wait [#allocation4], 256  }
  0x24   :  { %411 = vsyncadd [#allocation4], 4294967040 }
  0x25   :  { %412 = dma.done.wait [#allocation7], 4096  }
  0x26   :  { %413 = vsyncadd [#allocation7], 4294963200  ;;  %v66_v0 = vld [vmem:[#allocation6 + $0x80] sm:$0xff]  ;;  %v67_v1 = vld [vmem:[#allocation6 + $0x88] sm:$0xff]  ;;  %v420_v50 = vmov 0.0   ;;  %vm421_vm0 = vmmov 0   ;;  %v162_v58 = vstv %s509_s4 }
  0x27   :  { %v50_v2 = vld [vmem:[#allocation6] sm:$0xff]  ;;  %v301_v3 = vpack.c.bf16 %v67_v1, %v66_v0  ;;  %v51_v4 = vld [vmem:[#allocation6 + $0x8] sm:$0xff]  ;;  %v68_v5 = vld [vmem:[#allocation6 + $0x90] sm:$0xff]  ;;  %296 = vmatprep.subr.mxu1 %v420_v50  ;;  %298 = vmatprep.mubr.msk.f32.mxu1 %vm421_vm0, %v420_v50  ;;  %vm239_vm1 = vcmask 57344  }
  0x28   :  { %v69_v6 = vld [vmem:[#allocation6 + $0x98] sm:$0xff]  ;;  %v303_v7 = vpack.c.bf16 %v51_v4, %v50_v2  ;;  %v52_v9 = vld [vmem:[#allocation6 + $0x10] sm:$0xff]  ;;  %v70_v11 = vld [vmem:[#allocation6 + $0xa0] sm:$0xff] }
  0x29   :  { %v305_v8 = vpack.c.bf16 %v69_v6, %v68_v5  ;;  %v53_v10 = vld [vmem:[#allocation6 + $0x18] sm:$0xff]  ;;  %302 = vmatprep.subr.bf16.mxu0 %v301_v3  ;;  %v71_v12 = vld [vmem:[#allocation6 + $0xa8] sm:$0xff]  ;;  %v54_v15 = vld [vmem:[#allocation6 + $0x20] sm:$0xff] }
  0x2a   :  { %304 = vmatpush3.bf16.msra.mxu0 %v303_v7  ;;  %v307_v13 = vpack.c.bf16 %v53_v10, %v52_v9  ;;  %v309_v14 = vpack.c.bf16 %v71_v12, %v70_v11  ;;  %v55_v16 = vld [vmem:[#allocation6 + $0x28] sm:$0xff]  ;;  %v72_v17 = vld [vmem:[#allocation6 + $0xb0] sm:$0xff]  ;;  %v73_v18 = vld [vmem:[#allocation6 + $0xb8] sm:$0xff] }
  0x2b   :  { %306 = vmatprep.subr.bf16.mxu0 %v305_v8  ;;  %v311_v19 = vpack.c.bf16 %v55_v16, %v54_v15  ;;  %v313_v20 = vpack.c.bf16 %v73_v18, %v72_v17  ;;  %v56_v21 = vld [vmem:[#allocation6 + $0x30] sm:$0xff]  ;;  %v57_v22 = vld [vmem:[#allocation6 + $0x38] sm:$0xff]  ;;  %v74_v23 = vld [vmem:[#allocation6 + $0xc0] sm:$0xff] }
  0x2c   :  { %v75_v24 = vld [vmem:[#allocation6 + $0xc8] sm:$0xff]  ;;  %v49_v25 = vld [vmem:[#allocation3 + $0x8] sm:$0xff]  ;;  %v315_v26 = vpack.c.bf16 %v57_v22, %v56_v21  ;;  %v58_v28 = vld [vmem:[#allocation6 + $0x40] sm:$0xff] }
  0x2d   :  { %153 = vmatprep.mubr.f32.mxu0 %v49_v25  ;;  %v317_v27 = vpack.c.bf16 %v75_v24, %v74_v23  ;;  %v59_v29 = vld [vmem:[#allocation6 + $0x48] sm:$0xff]  ;;  %v76_v30 = vld [vmem:[#allocation6 + $0xd0] sm:$0xff]  ;;  %v77_v31 = vld [vmem:[#allocation6 + $0xd8] sm:$0xff] }
  0x2e   :  { %308 = vmatpush3.bf16.msra.mxu0 %v307_v13  ;;  %v319_v32 = vpack.c.bf16 %v59_v29, %v58_v28  ;;  %v321_v33 = vpack.c.bf16 %v77_v31, %v76_v30  ;;  %v60_v34 = vld [vmem:[#allocation6 + $0x50] sm:$0xff]  ;;  %v61_v35 = vld [vmem:[#allocation6 + $0x58] sm:$0xff]  ;;  %v78_v36 = vld [vmem:[#allocation6 + $0xe0] sm:$0xff] }
  0x2f   :  { %310 = vmatprep.subr.bf16.mxu0 %v309_v14  ;;  %v79_v37 = vld [vmem:[#allocation6 + $0xe8] sm:$0xff]  ;;  %v323_v38 = vpack.c.bf16 %v61_v35, %v60_v34  ;;  %v62_v40 = vld [vmem:[#allocation6 + $0x60] sm:$0xff]  ;;  %v80_v42 = vld [vmem:[#allocation6 + $0xf0] sm:$0xff] }
  0x30   :  { %v325_v39 = vpack.c.bf16 %v79_v37, %v78_v36  ;;  %v63_v41 = vld [vmem:[#allocation6 + $0x68] sm:$0xff]  ;;  %v81_v43 = vld [vmem:[#allocation6 + $0xf8] sm:$0xff]  ;;  %v64_v46 = vld [vmem:[#allocation6 + $0x70] sm:$0xff] }
  0x31   :  { %v327_v44 = vpack.c.bf16 %v63_v41, %v62_v40  ;;  %v329_v45 = vpack.c.bf16 %v81_v43, %v80_v42  ;;  %v65_v47 = vld [vmem:[#allocation6 + $0x78] sm:$0xff]  ;;  %v48_v49 = vld [vmem:[#allocation3] sm:$0xff] }
  0x32   :  { %312 = vmatpush3.bf16.msra.mxu0 %v311_v19  ;;  %v331_v48 = vpack.c.bf16 %v65_v47, %v64_v46  ;;  %v257_v53 = vld [vmem:[%s507_s2] ss:$0 sm:$0xff]  ;;  %s422_s2 = smov [#allocation8]  }
  0x33   :  { %314 = vmatprep.subr.bf16.mxu0 %v313_v20  ;;  %v160_v57 = vld [vmem:[%s508_s3] sm:$0x1]  ;;  %s247_s23 = sshll.u32 %s422_s2, 4  ;;  %s248_s23 = int_to_ptr.vmem [resolvable:$true] %s247_s23 }
  0x34   :  { %s388_s3 = scalar_lea.vmem %s248_s23, 16  ;;  %s392_s24 = scalar_lea.vmem %s248_s23, 32 }
  0x35   :  { %p389_p2 = scmp.ne.s32.totalorder %s248_s23, %s388_s3  ;;  %p393_p3 = scmp.lt.s32.totalorder %s248_s23, %s248_s23 }
  0x36   :  { %316 = vmatpush3.bf16.msra.mxu0 %v315_v26  ;;  %p394_p4 = scmp.lt.s32.totalorder %s392_s24, %s388_s3 }
  0x37   :  { %318 = vmatprep.subr.bf16.mxu0 %v317_v27 }
  0x38   :  { %p395_p5 = por %p394_p4, %p393_p3 }
  0x3a   :  { %320 = vmatpush3.bf16.msra.mxu0 %v319_v32  ;;  %p396_p6 = pnand %p395_p5, %p389_p2 }
  0x3b   :  { %322 = vmatprep.subr.bf16.mxu0 %v321_v33 }
  0x3e   :  { %324 = vmatpush3.bf16.msra.mxu0 %v323_v38 }
  0x3f   :  { %326 = vmatprep.subr.bf16.mxu0 %v325_v39 }
  0x42   :  { %328 = vmatpush3.bf16.msra.mxu0 %v327_v44 }
  0x43   :  { %330 = vmatprep.subr.bf16.mxu0 %v329_v45 }
  0x46   :  { %332 = vmatpush3.bf16.msra.mxu0 %v331_v48 }
  0x49   :  { %154 = vmatmul.mubr.f32.vlgmr.msra.gmra.mrb[0].mxu0 %v48_v49 }
 0x11c   :  { %v291_v51 = vpop.f32.mrb[0].mxu0 }
 0x11d   :  { %v292_v52 = vpop.f32.mrb[1].mxu0 }
 0x11e   :  { %v293_v54 = vadd.f32 %v292_v52, %v291_v51 }
 0x120   :  { %v156_v55 = vadd.f32 %v293_v54, %v257_v53 }
 0x122   :  { %v159_v56 = vmax.f32 %v156_v55, 0.0 }
 0x124   :  { %297 = vmatpush3.xpose.msra.mxu1 %v159_v56 }
 0x127   :  { %299 = vmatmul.mubr.f32.vlgmr.msra.gmra.mrb[0].mxu1 %v160_v57 }
 0x1fa   :  { %v229_v59 = vpop.f32.mrb[0].mxu1 }
 0x1fb   :  { %v230_v60 = vadd.f32 %v229_v59, %v162_v58  ;;  %v300_v61 = vpop.f32.mrb[1].mxu1 }
 0x1fd   :  { %v258_v62 = vmul.f32 -1.442695, %v230_v60 }
 0x1ff   :  { %340 = vpow2.f32 %v258_v62 }
 0x209   :  { %v341_v63 = vpop.eup %340 }
 0x20a   :  { %v236_v0 = vadd.f32 1.0, %v341_v63 }
 0x20c   :  { %342 = vrcp.f32 %v236_v0 }
 0x216   :  { %v343_v1 = vpop.eup %342 }
 0x217   :  { %240 = vst.msk [vmem:[#allocation8] sm:$0x1] %vm239_vm1, %v343_v1 }
 0x218   :  { %399 = shalt.err (!%p396_p6)
}
 0x219   :  { %s400_s26 = scalar_lea.hbm %s510_s5, 16 }
 0x21a   :  { %p401_p7 = scmp.ne.s32.totalorder %s510_s5, %s400_s26  ;;  %p404_p8 = scmp.lt.u32.totalorder %s400_s26, %s510_s5 }
 0x21c   :  { %p406_p9 = pnand %p404_p8, %p401_p7 }
 0x21e   :  { %409 = shalt.err (!%p406_p9)
}
 0x21f   :  { %250 = dma.vmem_to_hbm [thread:$0]  %s248_s23, 16, %s510_s5, [#allocation5]  }
 0x220   :  { %414 = dma.done.wait [#allocation5], 16  }
 0x221   :  { %415 = vsyncadd [#allocation5], 4294967280 }
 0x222   :  { %254 = vsyncpa [#allocation4], 1 }
 0x223   :  { %255 = vsyncpa [#allocation7], 1 }
 0x224   :  { %256 = vsyncpa [#allocation5], 1 }

</bundles_post_ra>
